<compile_context>
chip_gen: v5e
topology: v5e:2x2
jax: 0.10.0
libtpu: 0.0.40
codegen_flags: <defaults>
</compile_context>

<pallas_src>
import functools

import jax
import jax.numpy as jnp
from jax.experimental import pallas as pl
from jax.experimental.pallas import tpu as pltpu


def _affine_kernel(scale_ref, shift_ref, x_ref, o_ref):
    # scale/shift blocks broadcast against the data block on the VPU:
    #   main path : (C_TILE, 1)      vs (N_TILE, C_TILE, HW_TILE)
    #   flat path : (1, L_TILE)      vs (N_TILE, L_TILE)
    o_ref[...] = (x_ref[...] * scale_ref[...] + shift_ref[...]).astype(o_ref.dtype)


def _cdiv(a, b):
    return -(-a // b)


def _round_up(x, m):
    return _cdiv(x, m) * m


def _chip_plan():
    """(block byte target, scoped-VMEM limit) per TPU generation."""
    kind = ""
    try:
        kind = jax.devices()[0].device_kind.lower()
    except Exception:
        pass
    if "v7" in kind or "7x" in kind:
        return 6 * 2**20, 48 * 2**20   # 64 MiB VMEM/TC, ~3.2 TB/s HBM
    if "v6" in kind:
        return 4 * 2**20, 32 * 2**20
    if "v5" in kind:
        return 2 * 2**20, 32 * 2**20
    return 4 * 2**20, 32 * 2**20       # unknown chip: safe middle ground


def _choose_tiles_3d(n, c, hw, itemsize, target_bytes):
    """Block shape for the (N, C, H*W) layout: (n_tile, c_tile[x8], hw_tile[x128])."""
    t_elems = max(8 * 128, target_bytes // itemsize)
    hw_pad = _round_up(hw, 128)
    # Lane axis first; reserve a factor of 8 for the channel (sublane) axis.
    hw_tile = min(hw_pad, max(128, (t_elems // 8) // 128 * 128))
    # Channel (sublane) axis: multiple of 8, or the full extent for tiny C.
    if c <= 8:
        c_tile = c
    else:
        c_tile = max(8, min(_round_up(c, 8), (t_elems // hw_tile) // 8 * 8))
    # Batch axis is not a layout axis; fill the remaining byte budget with it.
    n_tile = max(1, min(n, t_elems // (hw_tile * c_tile)))

    # Guarantee >= 2 grid steps whenever splittable (v7x has 2 TensorCores).
    if _cdiv(n, n_tile) * _cdiv(c, c_tile) * _cdiv(hw, hw_tile) < 2:
        if n > 1:
            n_tile = _cdiv(n, 2)
        elif c_tile >= 16:
            c_tile = max(8, (c_tile // 2) // 8 * 8)
        elif hw_tile >= 256:
            hw_tile = max(128, (hw_tile // 2) // 128 * 128)
    return n_tile, c_tile, hw_tile


def _choose_tiles_2d(n, l, itemsize, target_bytes):
    """Block shape for the flattened (N, C*H*W) layout: (n_tile[x8], l_tile[x128])."""
    t_elems = max(8 * 128, target_bytes // itemsize)
    l_pad = _round_up(l, 128)
    l_tile = min(l_pad, max(128, (t_elems // max(1, min(n, 8))) // 128 * 128))
    if n <= 8:
        n_tile = n                      # full extent -> always layout-legal
    else:
        n_tile = max(8, min(_round_up(n, 8), (t_elems // l_tile) // 8 * 8))

    if _cdiv(n, n_tile) * _cdiv(l, l_tile) < 2:
        if l_tile >= 256:
            l_tile = max(128, (l_tile // 2) // 128 * 128)
        elif n_tile >= 16:
            n_tile = max(8, (n_tile // 2) // 8 * 8)
    return n_tile, l_tile


@functools.partial(jax.jit, static_argnames=("eps", "donate_x"))
def frozen_batch_norm_2d(x, weight, bias, running_mean, running_var,
                         eps=1e-5, donate_x=False):
    """x: (N, C, H, W); weight / bias / running_mean / running_var: (C,)."""
    n, c, h, w = x.shape
    hw = h * w
    itemsize = jnp.dtype(x.dtype).itemsize
    target_bytes, vmem_limit = _chip_plan()

    # Per-channel affine params, computed once in f32 (matches PyTorch forward),
    # then cast to the input's native width so the in-kernel FMA is native.
    scale = (weight.astype(jnp.float32)
             * jax.lax.rsqrt(running_var.astype(jnp.float32) + eps))
    shift = bias.astype(jnp.float32) - running_mean.astype(jnp.float32) * scale
    param_dtype = x.dtype if x.dtype == jnp.bfloat16 else jnp.float32
    scale = scale.astype(param_dtype)
    shift = shift.astype(param_dtype)

    total = n * c * hw
    cost = pl.CostEstimate(flops=2 * total, transcendentals=0,
                           bytes_accessed=2 * total * itemsize)

    # Small non-128-multiple H*W (7x7, 14x14, ...): pack channels into the lane
    # axis instead of padding 49 -> 128 lanes and issuing masked stores.
    use_flat = (hw % 128 != 0) and (hw < 256)

    if use_flat:
        l = c * hw
        x2 = x.reshape(n, l)                              # free for NCHW layout
        scale2 = jnp.repeat(scale, hw).reshape(1, l)
        shift2 = jnp.repeat(shift, hw).reshape(1, l)
        n_tile, l_tile = _choose_tiles_2d(n, l, itemsize, target_bytes)
        grid = (_cdiv(n, n_tile), _cdiv(l, l_tile))
        param_spec = pl.BlockSpec((1, l_tile), lambda ni, li: (0, li))
        data_spec = pl.BlockSpec((n_tile, l_tile), lambda ni, li: (ni, li))
        semantics = ("parallel", "parallel")
        args = (scale2, shift2, x2)
        out_shape = jax.ShapeDtypeStruct((n, l), x.dtype)
    else:
        x3 = x.reshape(n, c, hw)                          # lane axis = H*W
        scale2 = scale.reshape(c, 1)
        shift2 = shift.reshape(c, 1)
        n_tile, c_tile, hw_tile = _choose_tiles_3d(n, c, hw, itemsize, target_bytes)
        grid = (_cdiv(n, n_tile), _cdiv(c, c_tile), _cdiv(hw, hw_tile))
        param_spec = pl.BlockSpec((c_tile, 1), lambda ni, ci, hi: (ci, 0))
        data_spec = pl.BlockSpec((n_tile, c_tile, hw_tile),
                                 lambda ni, ci, hi: (ni, ci, hi))
        semantics = ("parallel", "parallel", "parallel")
        args = (scale2, shift2, x3)
        out_shape = jax.ShapeDtypeStruct((n, c, hw), x.dtype)

    out = pl.pallas_call(
        _affine_kernel,
        out_shape=out_shape,
        grid=grid,
        in_specs=[param_spec, param_spec, data_spec],
        out_specs=data_spec,
        compiler_params=pltpu.CompilerParams(
            dimension_semantics=semantics,
            vmem_limit_bytes=vmem_limit,
        ),
        cost_estimate=cost,
        input_output_aliases={2: 0} if donate_x else {},
    )(*args)

    return out.reshape(n, c, h, w)


def _reference(x, weight, bias, running_mean, running_var, eps):
    """Plain-JAX mirror of the PyTorch forward."""
    w_ = weight.reshape(1, -1, 1, 1)
    b_ = bias.reshape(1, -1, 1, 1)
    rv = running_var.reshape(1, -1, 1, 1)
    rm = running_mean.reshape(1, -1, 1, 1)
    scale = w_ * jax.lax.rsqrt(rv + eps)
    return x * scale + (b_ - rm * scale)


if __name__ == "__main__":
    key = jax.random.PRNGKey(0)
    eps = 1e-5

    def make_case(k, shape):
        _, c, _, _ = shape
        kx, kw, kb, km, kv = jax.random.split(k, 5)
        x = jax.random.normal(kx, shape, dtype=jnp.float32)
        weight = jax.random.normal(kw, (c,), dtype=jnp.float32)
        bias = jax.random.normal(kb, (c,), dtype=jnp.float32)
        rm = jax.random.normal(km, (c,), dtype=jnp.float32)
        rv = jax.random.uniform(kv, (c,), dtype=jnp.float32, minval=0.5, maxval=2.0)
        return x, weight, bias, rm, rv

    cases = [
        (2, 4, 16, 16),   # primary: lane-dense (N, C, H*W) path
        (2, 8, 7, 7),     # small H*W -> flattened (N, C*H*W) lane-packed path
        (3, 12, 17, 17),  # ragged N / C / H*W -> cdiv-padded edge blocks
    ]
    keys = jax.random.split(key, len(cases))
    for k, shape in zip(keys, cases):
        x, weight, bias, rm, rv = make_case(k, shape)
        out = frozen_batch_norm_2d(x, weight, bias, rm, rv, eps=eps)
        out = jax.block_until_ready(out)
        ref = _reference(x, weight, bias, rm, rv, eps)
        assert out.shape == x.shape and out.dtype == x.dtype
        assert jnp.allclose(out, ref, atol=1e-5, rtol=1e-5), f"mismatch at {shape}"

    print("KERNEL_OK")
</pallas_src>

<mosaic_0001>
module attributes {stable_mosaic.version = 11 : i64} {
  func.func @_affine_kernel(%arg0: i32, %arg1: i32, %arg2: i32, %arg3: memref<4x1xf32, #tpu.memory_space<vmem>>, %arg4: memref<4x1xf32, #tpu.memory_space<vmem>>, %arg5: memref<1x4x256xf32, #tpu.memory_space<vmem>>, %arg6: memref<1x4x256xf32, #tpu.memory_space<vmem>>) attributes {dimension_semantics = [#tpu.dimension_semantics<parallel>, #tpu.dimension_semantics<parallel>, #tpu.dimension_semantics<parallel>], iteration_bounds = array<i64: 2, 1, 1>, scalar_prefetch = 0 : i64, scratch_operands = 0 : i64, tpu.core_type = #tpu.core_type<tc>, window_params = [{transform_indices = @transform_0, window_bounds = array<i64: 4, 1>}, {transform_indices = @transform_1, window_bounds = array<i64: 4, 1>}, {transform_indices = @transform_2, window_bounds = array<i64: 1, 4, 256>}, {transform_indices = @transform_3, window_bounds = array<i64: 1, 4, 256>}]} {
    %c0 = arith.constant 0 : index
    %c0_0 = arith.constant 0 : index
    %c0_1 = arith.constant 0 : index
    %0 = vector.load %arg5[%c0, %c0_0, %c0_1] : memref<1x4x256xf32, #tpu.memory_space<vmem>>, vector<1x4x256xf32>
    %c0_2 = arith.constant 0 : index
    %c0_3 = arith.constant 0 : index
    %1 = vector.load %arg3[%c0_2, %c0_3] : memref<4x1xf32, #tpu.memory_space<vmem>>, vector<4x1xf32>
    %2 = vector.shape_cast %1 : vector<4x1xf32> to vector<1x4x1xf32>
    %3 = vector.broadcast %2 : vector<1x4x1xf32> to vector<1x4x256xf32>
    %4 = arith.mulf %0, %3 : vector<1x4x256xf32>
    %c0_4 = arith.constant 0 : index
    %c0_5 = arith.constant 0 : index
    %5 = vector.load %arg4[%c0_4, %c0_5] : memref<4x1xf32, #tpu.memory_space<vmem>>, vector<4x1xf32>
    %6 = vector.shape_cast %5 : vector<4x1xf32> to vector<1x4x1xf32>
    %7 = vector.broadcast %6 : vector<1x4x1xf32> to vector<1x4x256xf32>
    %8 = arith.addf %4, %7 : vector<1x4x256xf32>
    %c0_6 = arith.constant 0 : index
    %c0_7 = arith.constant 0 : index
    %c0_8 = arith.constant 0 : index
    %9 = vector.load %arg6[%c0_6, %c0_7, %c0_8] : memref<1x4x256xf32, #tpu.memory_space<vmem>>, vector<1x4x256xf32>
    tpu.vector_store %arg6[%c0_6, %c0_7, %c0_8], %8 {strides = array<i32>} : memref<1x4x256xf32, #tpu.memory_space<vmem>>, vector<1x4x256xf32>,
    return
  }
  func.func @transform_0(%arg0: i32, %arg1: i32, %arg2: i32) -> (i32, i32) {
    %c0_i32 = arith.constant 0 : i32
    %c0_i32_0 = arith.constant 0 : i32
    return %arg1, %c0_i32 : i32, i32
  }
  func.func @transform_1(%arg0: i32, %arg1: i32, %arg2: i32) -> (i32, i32) {
    %c0_i32 = arith.constant 0 : i32
    %c0_i32_0 = arith.constant 0 : i32
    return %arg1, %c0_i32 : i32, i32
  }
  func.func @transform_2(%arg0: i32, %arg1: i32, %arg2: i32) -> (i32, i32, i32) {
    %c0_i32 = arith.constant 0 : i32
    return %arg0, %arg1, %arg2 : i32, i32, i32
  }
  func.func @transform_3(%arg0: i32, %arg1: i32, %arg2: i32) -> (i32, i32, i32) {
    %c0_i32 = arith.constant 0 : i32
    return %arg0, %arg1, %arg2 : i32, i32, i32
  }
}

</mosaic_0001>

<bundles_post_ra>
// kernel: frozen_batch_norm_2d.1
= control target key start
LH: loop header
LB: loop body
LE: loop exit
PB: predicated region body
PF: predicated region fallthrough
CT: control target
= control target key end

     0   :  { %s529_s12 = smov 0   ;;  %s531_s13 = smov 0   ;;  %s565_s0 = inlined_call_operand.vmem [shape: f32[4,1], index: 0, kind: input, shape index: {}]   ;;  %s566_s1 = inlined_call_operand.vmem [shape: f32[4,1], index: 1, kind: input, shape index: {}]   ;;  %s567_s2 = inlined_call_operand.vmem [shape: f32[2,4,256], index: 2, kind: input, shape index: {}]   ;;  %s568_s3 = inlined_call_operand.vmem [shape: f32[2,4,256], index: 3, kind: output, shape index: {}]  }
   0x1   :  { %s533_s14 = smov 0  }
   0x2 LB: > { %s32_s15 = sadd.s32 1, %s501_s13  ;;  %p447_p0 = scmp.ge.s32.totalorder %s505_s14, 1  ;;  %s505_s14 = sphi %s533_s14, %s13_s14   ;;  %s501_s13 = sphi %s531_s13, %s570_s13   ;;  %s497_s12 = sphi %s529_s12, %s569_s12  }
   0x3   : > { %p34_p1 = scmp.ge.s32.totalorder %s32_s15, 2  ;;  %p191_p2 = scmp.lt.s32.totalorder %s505_s14, 3 }
   0x5   : > { %s572_s15 = smov (%p34_p1, %s32_s15), 0  ;;  %p192_p3 = pnand %p447_p0, %p191_p2 }
   0x6   : > { %p248_p4 = scmp.lt.s32.totalorder (!%p192_p3), %s497_s12, 1 }
   0x7   : > { %195 = sbr.rel (%p192_p3) target bundleno = 142 (0x8e), region = 32 }
   0xc   : > { %v276_v0 = vld [vmem:[%s565_s0] sm:$0xf]  ;;  %v507_v1 = vmov 0   ;;  %s574_s12 = smov (!%p248_p4, %s497_s12), 1  ;;  %v508_v3 = vmov 839922192  }
   0xd   : > { %482 = vset.pattern.permute.xlu0 %v507_v1  ;;  %v287_v2 = vld [vmem:[%s566_s1] sm:$0xf]  ;;  %v282_v4 = vunpack.c.l.s4 %v508_v3  ;;  %s454_s20 = sshll.u32 %s574_s12, 3 }
   0xe   : > { %279 = vperm.xlu0 %482, %v276_v0   ;;  %s259_s23 = scalar_lea.vmem %s567_s2, %s454_s20  ;;  %s273_s26 = scalar_lea.vmem %s568_s3, %s454_s20 }
   0xf   : > { %v283_v6 = vunpack.c.0.s8 %v282_v4  ;;  %v275_v8 = vld [vmem:[%s259_s23] sm:$0xff] }
  0x16   : > { %290 = vperm.xlu0 %482, %v287_v2  }
  0x80   : > { %v280_v5 = vpop.permute.xlu0 %279 }
  0x81   : > { %v284_v7 = vperm.slane %v280_v5, %v283_v6 }
  0x83   : > { %v286_v10 = vmul.f32 %v284_v7, %v275_v8 }
  0x88   : > { %v291_v9 = vpop.permute.xlu0 %290 }
  0x89   : > { %v295_v11 = vperm.slane %v291_v9, %v283_v6 }
  0x8b   : > { %v297_v12 = vadd.f32 %v295_v11, %v286_v10 }
  0x8d   : > { %298 = vst [vmem:[%s273_s26] sm:$0xff] %v297_v12 }
  0x8e PF: > { %s13_s14 = sadd.s32 1, %s505_s14   ;;  %s569_s12 = smov %s501_s13 }
  0x8f   : > { %p10_p5 = scmp.ge.s32.totalorder %s13_s14, 4   ;;  %s570_s13 = smov %s572_s15 }
  0x91   :  { %12 = sbr.rel (!%p10_p5) target bundleno = 2 (0x2), region = 68 }

</bundles_post_ra>
